<compile_context>
chip_gen: v6e
topology: v6e:2x2x1
jax: 0.10.0
libtpu: 0.0.40
codegen_flags: <defaults>
</compile_context>

<pallas_src>
import functools

import jax
import jax.numpy as jnp
from jax import lax
from jax.experimental import pallas as pl
from jax.experimental.pallas import tpu as pltpu

_LANE_CANDIDATES = (4096, 2048, 1024, 512, 256, 128)  # lane-dense widths (multiples of 128)


def _scoped_vmem_limit():
    """Per-generation scoped-VMEM budget: 64 MiB on v5e/v6e (128 MiB physical),
    32 MiB on v7x (64 MiB physical) or whenever the hardware query fails."""
    default = 32 * 1024 * 1024
    try:
        phys = int(pltpu.get_tpu_info().vmem_capacity_bytes)
        return min(64 * 1024 * 1024, max(default, phys // 2))
    except Exception:
        return default


_VMEM_LIMIT = _scoped_vmem_limit()


# ----------------------------------------------------------------------------- math
def _quantize(x_f32, m, M, n, inv_n):
    """Element-wise uniform quantization given the global min/max (all f32)."""
    rng = M - m
    inv_rng = 1.0 / rng                   # one scalar divide; per-element math is multiply-only
    xn = (x_f32 - m) * inv_rng
    if n is None:                         # abitW == 1 -> sign quantization (applied twice, as in torch)
        q = jnp.sign(jnp.sign(xn))
    else:
        q = jnp.round(xn * n) * inv_n     # first uniform_q
        q = jnp.round(q * n) * inv_n      # second uniform_q (matches the torch code exactly)
    return q * rng + m


# ----------------------------------------------------------------------------- kernels
def _fused_kernel(x_ref, o_ref, *, n, inv_n):
    """Fast path: global min/max + quantization in a single block."""
    x = x_ref[...].astype(jnp.float32)
    m = jnp.min(x)
    M = jnp.max(x)
    o_ref[...] = _quantize(x, m, M, n, inv_n).astype(o_ref.dtype)


def _minmax_kernel(x_ref, min_ref, max_ref, acc_min, acc_max, *,
                   rows_total, block_rows):
    """Pass 1: tiled global min/max over a single sequential grid axis."""
    i = pl.program_id(0)
    nb = pl.num_programs(0)
    x = x_ref[...].astype(jnp.float32)

    if rows_total % block_rows:
        # The last row-block is partial: mask out-of-range rows so undefined
        # padding never reaches the global min/max.
        row_ids = lax.broadcasted_iota(jnp.int32, (x.shape[0], 1), 0) + i * block_rows
        valid = row_ids < rows_total
        x_min = jnp.where(valid, x, jnp.inf)
        x_max = jnp.where(valid, x, -jnp.inf)
    else:
        x_min = x
        x_max = x

    t_min = jnp.min(x_min, axis=0, keepdims=True)     # (1, C) lane-wise partial
    t_max = jnp.max(x_max, axis=0, keepdims=True)

    @pl.when(i == 0)
    def _():
        acc_min[...] = t_min
        acc_max[...] = t_max

    @pl.when(i > 0)
    def _():
        acc_min[...] = jnp.minimum(acc_min[...], t_min)
        acc_max[...] = jnp.maximum(acc_max[...], t_max)

    @pl.when(i == nb - 1)
    def _():
        # One cross-lane reduce at the very end; the scalar is broadcast into a
        # full (8,128) output tile (layout-legal, written back exactly once).
        min_ref[...] = jnp.zeros_like(min_ref) + jnp.min(acc_min[...])
        max_ref[...] = jnp.zeros_like(max_ref) + jnp.max(acc_max[...])


def _quant_kernel(min_ref, max_ref, x_ref, o_ref, *, n, inv_n):
    """Pass 2: element-wise quantization of one lane-dense block.
    min/max arrive as (1,1) SMEM scalars."""
    m = min_ref[0, 0]
    M = max_ref[0, 0]
    x = x_ref[...].astype(jnp.float32)
    # Garbage rows of a partial last block are computed but dropped on writeback.
    o_ref[...] = _quantize(x, m, M, n, inv_n).astype(o_ref.dtype)


# ----------------------------------------------------------------------------- wrapper
def _pick_width(total):
    """Largest lane-dense width (multiple of 128) that tiles `total` elements."""
    for c in _LANE_CANDIDATES:
        if total % c == 0 and total // c >= 8:
            return c
    for c in _LANE_CANDIDATES:
        if total % c == 0:
            return c
    return None


def _activation_quantize(x, abitW):
    if abitW == 32:
        return x

    if abitW == 1:
        n, inv_n = None, None
    else:
        n = float(2 ** abitW - 1)
        inv_n = 1.0 / n

    orig_shape = x.shape
    orig_dtype = x.dtype
    total = x.size
    itemsize = x.dtype.itemsize
    c = _pick_width(total)

    # ---------------- fast path: the whole tensor is one fused VMEM block ----------------
    # Byte budget per element: in + out buffers (input dtype) + f32 working copy
    # and elementwise temp headroom.
    fused_bpe = 2 * itemsize + 16
    if total * fused_bpe <= _VMEM_LIMIT and (c is not None or total <= 16 * 1024):
        x2 = x.reshape((total // c, c)) if c is not None else x.reshape((1, total))
        out2 = pl.pallas_call(
            functools.partial(_fused_kernel, n=n, inv_n=inv_n),
            out_shape=jax.ShapeDtypeStruct(x2.shape, orig_dtype),
            compiler_params=pltpu.CompilerParams(vmem_limit_bytes=_VMEM_LIMIT),
        )(x2)
        return out2.reshape(orig_shape)

    # ---------------- large path: tiled reduction + element-wise pass ----------------
    tail = None
    if c is None:
        # Ragged total (not a multiple of 128): run the kernels on the 128-aligned
        # prefix and fold the <128-element tail in with plain JAX (no padded HBM
        # copy of the whole tensor).
        c = 128
        flat = x.reshape((-1,))
        prefix = (total // c) * c
        tail = flat[prefix:]
        x2 = flat[:prefix].reshape((-1, c))
    else:
        x2 = x.reshape((total // c, c))

    rows = x2.shape[0]

    # Block byte budget (double-buffered in + out in the input dtype plus f32 temp
    # headroom), derived from the per-generation scoped-VMEM limit.  Byte-based so
    # bf16/int8 activations still issue large DMAs per grid step.
    bytes_per_elem = 4 * itemsize + 8
    block_elems = max(8 * 128, int((_VMEM_LIMIT * 3 // 4) // bytes_per_elem))
    block_rows = max(8, (block_elems // c) // 8 * 8)
    block_rows = min(block_rows, rows)
    num_blocks = -(-rows // block_rows)

    # pass 1: global min/max -> one (8,128) broadcast tile per bound.
    # TODO(synk): on v7x (2 TensorCores) shard this reduction with CORE_PARALLEL /
    # pl.core_map; the single "arbitrary" axis is optimal for single-TC v5e/v6e
    # but leaves half of a v7x chip idle during pass 1.
    mn, mx = pl.pallas_call(
        functools.partial(_minmax_kernel, rows_total=rows, block_rows=block_rows),
        out_shape=(jax.ShapeDtypeStruct((8, 128), jnp.float32),
                   jax.ShapeDtypeStruct((8, 128), jnp.float32)),
        grid_spec=pltpu.PrefetchScalarGridSpec(
            num_scalar_prefetch=0,
            grid=(num_blocks,),
            in_specs=[pl.BlockSpec((block_rows, c), lambda i: (i, 0))],
            out_specs=(pl.BlockSpec((8, 128), lambda i: (0, 0)),
                       pl.BlockSpec((8, 128), lambda i: (0, 0))),
            scratch_shapes=[pltpu.VMEM((1, c), jnp.float32),
                            pltpu.VMEM((1, c), jnp.float32)],
        ),
        compiler_params=pltpu.CompilerParams(
            dimension_semantics=("arbitrary",),
            vmem_limit_bytes=_VMEM_LIMIT),
    )(x2)

    m_s = jnp.min(mn)            # trivial XLA reduce of one 8x128 tile
    M_s = jnp.max(mx)
    if tail is not None:         # fold the ragged tail into the global bounds
        tail_f32 = tail.astype(jnp.float32)
        m_s = jnp.minimum(m_s, jnp.min(tail_f32))
        M_s = jnp.maximum(M_s, jnp.max(tail_f32))
    mn_s = m_s.reshape((1, 1))
    mx_s = M_s.reshape((1, 1))

    # pass 2: element-wise quantization over lane-dense blocks; the bounds enter
    # as two (1,1) SMEM scalars (pure VPU + DMA in the kernel body).
    out2 = pl.pallas_call(
        functools.partial(_quant_kernel, n=n, inv_n=inv_n),
        out_shape=jax.ShapeDtypeStruct(x2.shape, orig_dtype),
        grid_spec=pltpu.PrefetchScalarGridSpec(
            num_scalar_prefetch=0,
            grid=(num_blocks,),
            in_specs=[
                pl.BlockSpec(memory_space=pltpu.MemorySpace.SMEM),
                pl.BlockSpec(memory_space=pltpu.MemorySpace.SMEM),
                # TODO(synk): sweep pipeline_mode=pl.Buffered(3) on this spec if a
                # profile shows the input-read / output-write DMAs contending.
                pl.BlockSpec((block_rows, c), lambda i: (i, 0)),
            ],
            out_specs=pl.BlockSpec((block_rows, c), lambda i: (i, 0)),
        ),
        compiler_params=pltpu.CompilerParams(
            dimension_semantics=("parallel",),
            vmem_limit_bytes=_VMEM_LIMIT),
    )(mn_s, mx_s, x2)

    if tail is not None:
        # TODO(synk): the concatenate re-copies the prefix output once; rare path.
        tail_q = _quantize(tail.astype(jnp.float32), m_s, M_s, n, inv_n).astype(orig_dtype)
        return jnp.concatenate([out2.reshape((-1,)), tail_q]).reshape(orig_shape)
    return out2.reshape(orig_shape)


activation_quantize = jax.jit(_activation_quantize, static_argnums=(1,))


# ----------------------------------------------------------------------------- reference & checks
def _reference(x, abitW):
    """Pure-JAX port of the PyTorch forward (literal division, as in torch)."""
    if abitW == 32:
        return x
    m = jnp.min(x)
    M = jnp.max(x)
    xn = (x - m) / (M - m)
    if abitW == 1:
        q = jnp.sign(jnp.sign(xn))
    else:
        nn = 2 ** abitW - 1
        q = jnp.round(xn * nn) / nn
        q = jnp.round(q * nn) / nn
    return (q * (M - m) + m).astype(x.dtype)


def _check_close(out, ref, x, abitW, name):
    """Kernel-vs-reference parity check.

    The kernel folds the range division into a scalar reciprocal + multiplies
    (per the perf guidance) while the reference divides element-wise like the
    PyTorch code; the two f32 formulations agree to a couple of ulps, which can
    in principle resolve an exact round-to-nearest tie differently for a handful
    of elements.  So: essentially all elements must match to float precision and
    any residual difference must be at most one quantization level.
    """
    out = jnp.asarray(out, jnp.float32)
    ref = jnp.asarray(ref, jnp.float32)
    err = jnp.abs(out - ref)
    close = err <= (1e-6 + 1e-6 * jnp.abs(ref))
    if abitW == 1:
        assert bool(jnp.all(close)), f"{name}: mismatch vs reference"
        return
    step = (jnp.max(x) - jnp.min(x)) / float(2 ** abitW - 1)
    frac_bad = jnp.mean(jnp.logical_not(close).astype(jnp.float32))
    assert float(frac_bad) <= 1e-3, f"{name}: too many mismatches ({float(frac_bad):.2e})"
    assert float(jnp.max(err)) <= float(step) * 1.001 + 1e-5, f"{name}: error beyond one level"


# ----------------------------------------------------------------------------- main
if __name__ == "__main__":
    key = jax.random.PRNGKey(0)
    # NCHW activation tensor, as in the PyTorch module's typical use.
    x = jax.random.normal(key, (2, 4, 16, 16), dtype=jnp.float32)

    abitW = 4  # module __init__ arg; deterministic, fixed in-script
    out = jax.block_until_ready(activation_quantize(x, abitW))
    assert out.shape == x.shape and out.dtype == x.dtype
    _check_close(out, _reference(x, abitW), x, abitW, "abitW=4 fused path")

    # 1-bit (sign) path
    out1 = jax.block_until_ready(activation_quantize(x, 1))
    _check_close(out1, _reference(x, 1), x, 1, "abitW=1 fused path")

    # 32-bit pass-through
    out32 = jax.block_until_ready(activation_quantize(x, 32))
    assert bool(jnp.all(out32 == x))

    # Ragged element count (not a multiple of 128): aligned-prefix kernels + JAX tail.
    xr = jax.random.normal(jax.random.PRNGKey(0), (3, 101, 103), dtype=jnp.float32)
    outr = jax.block_until_ready(activation_quantize(xr, abitW))
    assert outr.shape == xr.shape and outr.dtype == xr.dtype
    _check_close(outr, _reference(xr, abitW), xr, abitW, "abitW=4 ragged path")

    # Larger activation exercising the two-pass path on every generation:
    # multi-block min/max reduction, big lane-dense blocks, masked partial block.
    xl = jax.random.normal(jax.random.PRNGKey(0), (9, 512, 32, 32), dtype=jnp.float32)
    outl = jax.block_until_ready(activation_quantize(xl, abitW))
    assert outl.shape == xl.shape and outl.dtype == xl.dtype
    _check_close(outl, _reference(xl, abitW), xl, abitW, "abitW=4 two-pass path")

    print("KERNEL_OK")
</pallas_src>

<mosaic_0001>
module attributes {stable_mosaic.version = 11 : i64} {
  func.func @_fused_kernel(%arg0: memref<8x256xf32, #tpu.memory_space<vmem>>, %arg1: memref<8x256xf32, #tpu.memory_space<vmem>>) attributes {dimension_semantics = [], scalar_prefetch = 0 : i64, scratch_operands = 0 : i64, tpu.core_type = #tpu.core_type<tc>} {
    %c0 = arith.constant 0 : index
    %c0_0 = arith.constant 0 : index
    %0 = vector.load %arg0[%c0, %c0_0] : memref<8x256xf32, #tpu.memory_space<vmem>>, vector<8x256xf32>
    %1 = vector.shape_cast %0 : vector<8x256xf32> to vector<1x8x256xf32>
    %cst = arith.constant dense<0x7F800000> : vector<1xf32>
    %2 = vector.multi_reduction <minimumf>, %1, %cst [1, 2] : vector<1x8x256xf32> to vector<1xf32>
    %3 = vector.shape_cast %2 : vector<1xf32> to vector<1x1x1xf32>
    %4 = vector.extract %3[0, 0, 0] : f32 from vector<1x1x1xf32>
    %5 = vector.shape_cast %0 : vector<8x256xf32> to vector<1x8x256xf32>
    %cst_1 = arith.constant dense<0xFF800000> : vector<1xf32>
    %6 = vector.multi_reduction <maximumf>, %5, %cst_1 [1, 2] : vector<1x8x256xf32> to vector<1xf32>
    %7 = vector.shape_cast %6 : vector<1xf32> to vector<1x1x1xf32>
    %8 = vector.extract %7[0, 0, 0] : f32 from vector<1x1x1xf32>
    %9 = arith.subf %8, %4 : f32
    %cst_2 = arith.constant 1.000000e+00 : f32
    %10 = arith.divf %cst_2, %9 : f32
    %11 = vector.broadcast %4 : f32 to vector<8x256xf32>
    %12 = arith.subf %0, %11 : vector<8x256xf32>
    %13 = vector.broadcast %10 : f32 to vector<8x256xf32>
    %14 = arith.mulf %12, %13 : vector<8x256xf32>
    %cst_3 = arith.constant 1.500000e+01 : f32
    %15 = vector.broadcast %cst_3 : f32 to vector<8x256xf32>
    %16 = arith.mulf %14, %15 : vector<8x256xf32>
    %17 = math.roundeven %16 : vector<8x256xf32>
    %cst_4 = arith.constant 0.0666666701 : f32
    %18 = vector.broadcast %cst_4 : f32 to vector<8x256xf32>
    %19 = arith.mulf %17, %18 : vector<8x256xf32>
    %cst_5 = arith.constant 1.500000e+01 : f32
    %20 = vector.broadcast %cst_5 : f32 to vector<8x256xf32>
    %21 = arith.mulf %19, %20 : vector<8x256xf32>
    %22 = math.roundeven %21 : vector<8x256xf32>
    %cst_6 = arith.constant 0.0666666701 : f32
    %23 = vector.broadcast %cst_6 : f32 to vector<8x256xf32>
    %24 = arith.mulf %22, %23 : vector<8x256xf32>
    %25 = vector.broadcast %9 : f32 to vector<8x256xf32>
    %26 = arith.mulf %24, %25 : vector<8x256xf32>
    %27 = vector.broadcast %4 : f32 to vector<8x256xf32>
    %28 = arith.addf %26, %27 : vector<8x256xf32>
    %c0_7 = arith.constant 0 : index
    %c0_8 = arith.constant 0 : index
    %29 = vector.load %arg1[%c0_7, %c0_8] : memref<8x256xf32, #tpu.memory_space<vmem>>, vector<8x256xf32>
    tpu.vector_store %arg1[%c0_7, %c0_8], %28 {strides = array<i32>} : memref<8x256xf32, #tpu.memory_space<vmem>>, vector<8x256xf32>,
    return
  }
}

</mosaic_0001>

<bundles_post_ra>
// kernel: _activation_quantize.1
= control target key start
LH: loop header
LB: loop body
LE: loop exit
PB: predicated region body
PF: predicated region fallthrough
CT: control target
= control target key end

     0   :  { %s125_s0 = inlined_call_operand.vmem [shape: f32[8,256], index: 0, kind: input, shape index: {}]   ;;  %s126_s1 = inlined_call_operand.vmem [shape: f32[8,256], index: 1, kind: output, shape index: {}]  }
   0x1   :  { %v8_v0 = vld [vmem:[%s125_s0] sm:$0xff]  ;;  %v9_v1 = vld [vmem:[%s125_s0 + $0x8] sm:$0xff] }
   0x2   :  { %v10_v2 = vmin.f32 %v8_v0, %v9_v1  ;;  %v20_v3 = vmax.f32 %v8_v0, %v9_v1 }
   0x4   :  { %11 = vmin.xlane.f32.xlu0 %v10_v2 }
   0x8   :  { %21 = vmax.xlane.f32.xlu0 %v20_v3 }
  0x8d   :  { %v12_v4 = vpop.xlane.xlu0 %11 }
  0x8e   :  { %v13_v5 = vrot.slane %v12_v4, 4 }
  0x90   :  { %v14_v6 = vmin.f32 %v12_v4, %v13_v5 }
  0x91   :  { %v22_v7 = vpop.xlane.xlu0 %21 }
  0x92   :  { %v15_v8 = vrot.slane %v14_v6, 2  ;;  %v23_v9 = vrot.slane %v22_v7, 4 }
  0x94   :  { %v24_v10 = vmax.f32 %v22_v7, %v23_v9  ;;  %v16_v11 = vmin.f32 %v14_v6, %v15_v8 }
  0x96   :  { %v25_v12 = vrot.slane %v24_v10, 2  ;;  %v17_v13 = vrot.slane %v16_v11, 1 }
  0x98   :  { %v26_v14 = vmax.f32 %v24_v10, %v25_v12  ;;  %v18_v15 = vmin.f32 %v16_v11, %v17_v13 }
  0x9a   :  { %63 = vpush %v18_v15  ;;  %v27_v16 = vrot.slane %v26_v14, 1 }
  0x9c   :  { %v28_v17 = vmax.f32 %v26_v14, %v27_v16 }
  0x9e   :  { %65 = vpush %v28_v17 }
  0xcb   :  { %s64_s0 = spop %63 }
  0xcc   :  { %v34_v20 = vstv %s64_s0 }
  0xcd   :  { %v35_v21 = vsub.f32 %v8_v0, %v34_v20  ;;  %v36_v22 = vsub.f32 %v9_v1, %v34_v20 }
  0xcf   :  { %s66_s10 = spop %65 }
  0xd0   :  { %s30_s11 = ssub.f32 %s66_s10, %s64_s0 }
  0xd2   :  { %v31_v18 = vstv %s30_s11 }
  0xd3   :  { %101 = vrcp.f32 %v31_v18 }
  0xe0   :  { %v102_v19 = vpop.eup %101 }
  0xe1   :  { %67 = vpush %v102_v19 }
 0x112   :  { %s68_s12 = spop %67 }
 0x113   :  { %v37_v23 = vstv %s68_s12 }
 0x114   :  { %v38_v24 = vmul.f32 %v37_v23, %v35_v21  ;;  %v39_v25 = vmul.f32 %v37_v23, %v36_v22 }
 0x116   :  { %v40_v26 = vmul.f32 15.0, %v38_v24  ;;  %v41_v27 = vmul.f32 15.0, %v39_v25 }
 0x118   :  { %v71_v28 = vcvt.f32.s32 %v40_v26  ;;  %v79_v29 = vcvt.f32.s32 %v41_v27  ;;  %v69_v31 = vand.u32 2147483647, %v40_v26  ;;  %v74_v34 = vand.u32 2147483648, %v40_v26 }
 0x119   :  { %v77_v35 = vand.u32 2147483647, %v41_v27  ;;  %v82_v37 = vand.u32 2147483648, %v41_v27 }
 0x11a   :  { %v72_v30 = vcvt.s32.f32 %v71_v28  ;;  %v80_v32 = vcvt.s32.f32 %v79_v29  ;;  %vm70_vm0 = vcmp.lt.f32.partialorder %v69_v31, 8388608.0 }
 0x11b   :  { %vm78_vm1 = vcmp.lt.f32.partialorder %v77_v35, 8388608.0 }
 0x11c   :  { %v73_v33 = vand.u32 2147483647, %v72_v30  ;;  %v81_v36 = vand.u32 2147483647, %v80_v32 }
 0x11e   :  { %v75_v38 = vor.u32 %v74_v34, %v73_v33  ;;  %v83_v39 = vor.u32 %v82_v37, %v81_v36 }
 0x120   :  { %v76_v40 = vsel %vm70_vm0, %v75_v38, %v40_v26  ;;  %v84_v41 = vsel %vm78_vm1, %v83_v39, %v41_v27 }
 0x121   :  { %v44_v42 = vmul.f32 0.06666667, %v76_v40  ;;  %v45_v43 = vmul.f32 0.06666667, %v84_v41 }
 0x123   :  { %v46_v44 = vmul.f32 15.0, %v44_v42  ;;  %v47_v45 = vmul.f32 15.0, %v45_v43 }
 0x125   :  { %v87_v46 = vcvt.f32.s32 %v46_v44  ;;  %v95_v47 = vcvt.f32.s32 %v47_v45  ;;  %v85_v49 = vand.u32 2147483647, %v46_v44  ;;  %v90_v52 = vand.u32 2147483648, %v46_v44 }
 0x126   :  { %v93_v53 = vand.u32 2147483647, %v47_v45  ;;  %v98_v55 = vand.u32 2147483648, %v47_v45 }
 0x127   :  { %v88_v48 = vcvt.s32.f32 %v87_v46  ;;  %v96_v50 = vcvt.s32.f32 %v95_v47  ;;  %vm86_vm2 = vcmp.lt.f32.partialorder %v85_v49, 8388608.0 }
 0x128   :  { %vm94_vm3 = vcmp.lt.f32.partialorder %v93_v53, 8388608.0 }
 0x129   :  { %v89_v51 = vand.u32 2147483647, %v88_v48  ;;  %v97_v54 = vand.u32 2147483647, %v96_v50 }
 0x12b   :  { %v91_v56 = vor.u32 %v90_v52, %v89_v51  ;;  %v99_v57 = vor.u32 %v98_v55, %v97_v54 }
 0x12d   :  { %v92_v58 = vsel %vm86_vm2, %v91_v56, %v46_v44  ;;  %v100_v59 = vsel %vm94_vm3, %v99_v57, %v47_v45 }
 0x12e   :  { %v50_v60 = vmul.f32 0.06666667, %v92_v58  ;;  %v51_v61 = vmul.f32 0.06666667, %v100_v59 }
 0x130   :  { %v53_v62 = vmul.f32 %v50_v60, %v31_v18  ;;  %v54_v63 = vmul.f32 %v51_v61, %v31_v18 }
 0x132   :  { %v55_v0 = vadd.f32 %v53_v62, %v34_v20  ;;  %v56_v1 = vadd.f32 %v54_v63, %v34_v20 }
 0x134   :  { %57 = vst [vmem:[%s126_s1] sm:$0xff] %v55_v0  ;;  %58 = vst [vmem:[%s126_s1 + $0x8] sm:$0xff] %v56_v1 }

</bundles_post_ra>
